<compile_context>
chip_gen: v7x
topology: tpu7x:2x2x1
jax: 0.10.0
libtpu: 0.0.40
codegen_flags: <defaults>
</compile_context>

<pallas_src>
import math

import jax
import jax.numpy as jnp
from jax.experimental import pallas as pl
from jax.experimental.pallas import tpu as pltpu


# ----------------------------------------------------------------------------- kernels

def _lstm_cell_compute(x, h, c, w, b, out_dtype):
    """Shared LSTM math: fused [x|h] @ W matmul + gate nonlinearities (f32 throughout)."""
    xh = jnp.concatenate([x, h], axis=-1)                       # [B, In+H]
    gates = jnp.dot(xh, w, preferred_element_type=jnp.float32) + b   # [B, 4H]
    H = h.shape[-1]
    if H % 128 == 0:
        # Gate slices are vreg (lane-block) aligned -> slicing is free; one EUP pass/gate.
        i_g = jax.nn.sigmoid(gates[:, 0 * H:1 * H])
        f_g = jax.nn.sigmoid(gates[:, 1 * H:2 * H])
        g_g = jnp.tanh(gates[:, 2 * H:3 * H])
        o_g = jax.nn.sigmoid(gates[:, 3 * H:4 * H])
    else:
        # Lane-offset slices would need XLU relayouts; do 2 full-vreg EUP passes instead
        # and slice the activated results.
        sig = jax.nn.sigmoid(gates)
        tnh = jnp.tanh(gates)
        i_g = sig[:, 0 * H:1 * H]
        f_g = sig[:, 1 * H:2 * H]
        g_g = tnh[:, 2 * H:3 * H]
        o_g = sig[:, 3 * H:4 * H]
    c_new = f_g * c + i_g * g_g
    h_new = o_g * jnp.tanh(c_new)
    return h_new.astype(out_dtype), c_new.astype(out_dtype)


def _lstm_cell_kernel(x_ref, hidden_ref, w_ref, b_ref, out_ref):
    """One LSTM cell step, fully VMEM-resident, single fused matmul, stacked I/O."""
    h_new, c_new = _lstm_cell_compute(
        x_ref[...], hidden_ref[0], hidden_ref[1], w_ref[...], b_ref[...], out_ref.dtype)
    out_ref[0] = h_new
    out_ref[1] = c_new


def _lstm_seq_kernel(x_ref, hidden0_ref, w_ref, b_ref,
                     h_seq_ref, hidden_out_ref, state_ref):
    """T-step LSTM: grid iterates over time, state carried in VMEM scratch."""
    t = pl.program_id(0)

    @pl.when(t == 0)
    def _():
        state_ref[...] = hidden0_ref[...]

    h_new, c_new = _lstm_cell_compute(
        x_ref[0], state_ref[0], state_ref[1], w_ref[...], b_ref[...], jnp.float32)
    state_ref[0] = h_new
    state_ref[1] = c_new
    h_seq_ref[0] = h_new.astype(h_seq_ref.dtype)

    @pl.when(t == pl.num_programs(0) - 1)
    def _():
        hidden_out_ref[...] = state_ref[...].astype(hidden_out_ref.dtype)


# ---------------------------------------------------------------------------- wrappers

def lstm_operator_forward(inputs, hidden, w_fused, bias):
    """AbstractLSTMOperator.forward(inputs, hidden) -> new stacked hidden [2, B, H].

    inputs:  [B, In] f32
    hidden:  [2, B, H] f32   (hidden[0]=h, hidden[1]=c)
    w_fused: [In+H, 4H] f32  (concat of W_ih and W_hh, done once at setup)
    bias:    [1, 4H]   f32  (b_ih + b_hh folded)
    """
    B, _ = inputs.shape
    H = hidden.shape[-1]
    vmem = pl.BlockSpec(memory_space=pltpu.MemorySpace.VMEM)
    return pl.pallas_call(
        _lstm_cell_kernel,
        out_shape=jax.ShapeDtypeStruct((2, B, H), jnp.float32),
        in_specs=[vmem, vmem, vmem, vmem],
        out_specs=vmem,
    )(inputs, hidden, w_fused, bias)


def lstm_operator_forward_sequence(inputs_seq, hidden, w_fused, bias):
    """Run T LSTM steps inside one pallas_call; returns (h_seq [T,B,H], hidden_final [2,B,H])."""
    T, B, n_in = inputs_seq.shape
    H = hidden.shape[-1]
    grid_spec = pltpu.PrefetchScalarGridSpec(
        num_scalar_prefetch=0,
        grid=(T,),
        in_specs=[
            pl.BlockSpec((1, B, n_in), lambda t: (t, 0, 0)),      # x_t streamed over T
            pl.BlockSpec((2, B, H), lambda t: (0, 0, 0)),         # initial state (resident)
            pl.BlockSpec(w_fused.shape, lambda t: (0, 0)),        # weights stay VMEM-resident
            pl.BlockSpec(bias.shape, lambda t: (0, 0)),
        ],
        out_specs=[
            pl.BlockSpec((1, B, H), lambda t: (t, 0, 0)),         # per-step h
            pl.BlockSpec((2, B, H), lambda t: (0, 0, 0)),         # final (h, c), written at last step
        ],
        scratch_shapes=[pltpu.VMEM((2, B, H), jnp.float32)],      # carried recurrent state
    )
    h_seq, hidden_final = pl.pallas_call(
        _lstm_seq_kernel,
        out_shape=[
            jax.ShapeDtypeStruct((T, B, H), jnp.float32),
            jax.ShapeDtypeStruct((2, B, H), jnp.float32),
        ],
        grid_spec=grid_spec,
        compiler_params=pltpu.CompilerParams(dimension_semantics=("arbitrary",)),
    )(inputs_seq, hidden, w_fused, bias)
    return h_seq, hidden_final


# --------------------------------------------------------------------------- reference

def _reference_lstm_step(x, h, c, w_ih, w_hh, bias):
    gates = x @ w_ih + h @ w_hh + bias
    H = h.shape[-1]
    i = jax.nn.sigmoid(gates[:, 0 * H:1 * H])
    f = jax.nn.sigmoid(gates[:, 1 * H:2 * H])
    g = jnp.tanh(gates[:, 2 * H:3 * H])
    o = jax.nn.sigmoid(gates[:, 3 * H:4 * H])
    c_new = f * c + i * g
    h_new = o * jnp.tanh(c_new)
    return h_new, c_new


# -------------------------------------------------------------------------------- main

if __name__ == "__main__":
    # Lane-aligned small shapes: In and H multiples of 128 keep every gate slice
    # vreg-aligned and the stacked output lane-dense (no masked stores).
    n_input_state_variables = 128   # LSTM input size
    n_output_state_variables = 128  # LSTM hidden size
    batch = 8
    seq_len = 8

    key = jax.random.PRNGKey(0)
    k_x, k_h, k_c, k_wih, k_whh, k_bih, k_bhh, k_xs = jax.random.split(key, 8)

    bound = 1.0 / math.sqrt(n_output_state_variables)   # PyTorch LSTMCell init range
    x = jax.random.normal(k_x, (batch, n_input_state_variables), dtype=jnp.float32)
    h0 = jax.random.normal(k_h, (batch, n_output_state_variables), dtype=jnp.float32)
    c0 = jax.random.normal(k_c, (batch, n_output_state_variables), dtype=jnp.float32)
    hidden = jnp.stack([h0, c0], axis=0)                 # [2, B, H]

    w_ih = jax.random.uniform(
        k_wih, (n_input_state_variables, 4 * n_output_state_variables),
        minval=-bound, maxval=bound, dtype=jnp.float32)
    w_hh = jax.random.uniform(
        k_whh, (n_output_state_variables, 4 * n_output_state_variables),
        minval=-bound, maxval=bound, dtype=jnp.float32)
    b_ih = jax.random.uniform(
        k_bih, (1, 4 * n_output_state_variables),
        minval=-bound, maxval=bound, dtype=jnp.float32)
    b_hh = jax.random.uniform(
        k_bhh, (1, 4 * n_output_state_variables),
        minval=-bound, maxval=bound, dtype=jnp.float32)
    bias = b_ih + b_hh
    w_fused = jnp.concatenate([w_ih, w_hh], axis=0)      # [In+H, 4H], folded once at setup

    # --- single-step forward (the module's forward semantics) ---
    hidden_new = lstm_operator_forward(x, hidden, w_fused, bias)
    jax.block_until_ready(hidden_new)

    h_ref, c_ref = _reference_lstm_step(x, h0, c0, w_ih, w_hh, bias)
    assert jnp.allclose(hidden_new[0], h_ref, atol=2e-5, rtol=2e-5), "h mismatch"
    assert jnp.allclose(hidden_new[1], c_ref, atol=2e-5, rtol=2e-5), "c mismatch"

    # --- fused T-step recurrent path (amortizes launch/DMA overhead over the sequence) ---
    xs = jax.random.normal(
        k_xs, (seq_len, batch, n_input_state_variables), dtype=jnp.float32)
    h_seq, hidden_final = lstm_operator_forward_sequence(xs, hidden, w_fused, bias)
    jax.block_until_ready(h_seq)
    jax.block_until_ready(hidden_final)

    h_r, c_r = h0, c0
    hs_ref = []
    for t in range(seq_len):
        h_r, c_r = _reference_lstm_step(xs[t], h_r, c_r, w_ih, w_hh, bias)
        hs_ref.append(h_r)
    hs_ref = jnp.stack(hs_ref, axis=0)
    assert jnp.allclose(h_seq, hs_ref, atol=5e-5, rtol=5e-5), "h_seq mismatch"
    assert jnp.allclose(hidden_final[0], h_r, atol=5e-5, rtol=5e-5), "final h mismatch"
    assert jnp.allclose(hidden_final[1], c_r, atol=5e-5, rtol=5e-5), "final c mismatch"

    print("KERNEL_OK")
</pallas_src>

<mosaic_0001>
module attributes {stable_mosaic.version = 11 : i64} {
  func.func @_lstm_cell_kernel(%arg0: memref<8x128xf32, #tpu.memory_space<vmem>>, %arg1: memref<2x8x128xf32, #tpu.memory_space<vmem>>, %arg2: memref<256x512xf32, #tpu.memory_space<vmem>>, %arg3: memref<1x512xf32, #tpu.memory_space<vmem>>, %arg4: memref<2x8x128xf32, #tpu.memory_space<vmem>>) attributes {dimension_semantics = [], scalar_prefetch = 0 : i64, scratch_operands = 0 : i64, tpu.core_type = #tpu.core_type<tc>} {
    %c0 = arith.constant 0 : index
    %c0_0 = arith.constant 0 : index
    %0 = vector.load %arg0[%c0, %c0_0] : memref<8x128xf32, #tpu.memory_space<vmem>>, vector<8x128xf32>
    %c0_1 = arith.constant 0 : index
    %c0_2 = arith.constant 0 : index
    %c0_3 = arith.constant 0 : index
    %1 = vector.load %arg1[%c0_1, %c0_2, %c0_3] : memref<2x8x128xf32, #tpu.memory_space<vmem>>, vector<1x8x128xf32>
    %2 = vector.shape_cast %1 : vector<1x8x128xf32> to vector<8x128xf32>
    %c1 = arith.constant 1 : index
    %c0_4 = arith.constant 0 : index
    %c0_5 = arith.constant 0 : index
    %3 = vector.load %arg1[%c1, %c0_4, %c0_5] : memref<2x8x128xf32, #tpu.memory_space<vmem>>, vector<1x8x128xf32>
    %4 = vector.shape_cast %3 : vector<1x8x128xf32> to vector<8x128xf32>
    %c0_6 = arith.constant 0 : index
    %c0_7 = arith.constant 0 : index
    %5 = vector.load %arg2[%c0_6, %c0_7] : memref<256x512xf32, #tpu.memory_space<vmem>>, vector<256x512xf32>
    %c0_8 = arith.constant 0 : index
    %c0_9 = arith.constant 0 : index
    %6 = vector.load %arg3[%c0_8, %c0_9] : memref<1x512xf32, #tpu.memory_space<vmem>>, vector<1x512xf32>
    %7 = tpu.concatenate %0, %2 in 1 : vector<8x128xf32>, vector<8x128xf32> -> vector<8x256xf32>
    %cst = arith.constant dense<0.000000e+00> : vector<8x512xf32>
    %8 = tpu.matmul %7, %5, %cst {dimension_numbers = #tpu.dot_dimension_numbers<[1], [0], [0], [1], [0, 0, 1, 1], [], []>} : vector<8x256xf32>, vector<256x512xf32>, vector<8x512xf32> -> vector<8x512xf32>
    %9 = vector.broadcast %6 : vector<1x512xf32> to vector<8x512xf32>
    %10 = arith.addf %8, %9 : vector<8x512xf32>
    %11 = vector.extract_strided_slice %10 {offsets = [0, 0], sizes = [8, 128], strides = [1, 1]} : vector<8x512xf32> to vector<8x128xf32>
    %12 = arith.negf %11 : vector<8x128xf32>
    %13 = math.exp %12 : vector<8x128xf32>
    %cst_10 = arith.constant 1.000000e+00 : f32
    %14 = vector.broadcast %cst_10 : f32 to vector<8x128xf32>
    %15 = arith.addf %14, %13 : vector<8x128xf32>
    %16 = arith.divf %14, %15 : vector<8x128xf32>
    %17 = vector.extract_strided_slice %10 {offsets = [0, 128], sizes = [8, 128], strides = [1, 1]} : vector<8x512xf32> to vector<8x128xf32>
    %18 = arith.negf %17 : vector<8x128xf32>
    %19 = math.exp %18 : vector<8x128xf32>
    %cst_11 = arith.constant 1.000000e+00 : f32
    %20 = vector.broadcast %cst_11 : f32 to vector<8x128xf32>
    %21 = arith.addf %20, %19 : vector<8x128xf32>
    %22 = arith.divf %20, %21 : vector<8x128xf32>
    %23 = vector.extract_strided_slice %10 {offsets = [0, 256], sizes = [8, 128], strides = [1, 1]} : vector<8x512xf32> to vector<8x128xf32>
    %24 = math.tanh %23 : vector<8x128xf32>
    %25 = vector.extract_strided_slice %10 {offsets = [0, 384], sizes = [8, 128], strides = [1, 1]} : vector<8x512xf32> to vector<8x128xf32>
    %26 = arith.negf %25 : vector<8x128xf32>
    %27 = math.exp %26 : vector<8x128xf32>
    %cst_12 = arith.constant 1.000000e+00 : f32
    %28 = vector.broadcast %cst_12 : f32 to vector<8x128xf32>
    %29 = arith.addf %28, %27 : vector<8x128xf32>
    %30 = arith.divf %28, %29 : vector<8x128xf32>
    %31 = arith.mulf %22, %4 : vector<8x128xf32>
    %32 = arith.mulf %16, %24 : vector<8x128xf32>
    %33 = arith.addf %31, %32 : vector<8x128xf32>
    %34 = math.tanh %33 : vector<8x128xf32>
    %35 = arith.mulf %30, %34 : vector<8x128xf32>
    %c0_13 = arith.constant 0 : index
    %c0_14 = arith.constant 0 : index
    %c0_15 = arith.constant 0 : index
    %36 = vector.load %arg4[%c0_13, %c0_14, %c0_15] : memref<2x8x128xf32, #tpu.memory_space<vmem>>, vector<1x8x128xf32>
    %37 = vector.shape_cast %36 : vector<1x8x128xf32> to vector<8x128xf32>
    %38 = vector.shape_cast %35 : vector<8x128xf32> to vector<1x8x128xf32>
    tpu.vector_store %arg4[%c0_13, %c0_14, %c0_15], %38 {strides = array<i32>} : memref<2x8x128xf32, #tpu.memory_space<vmem>>, vector<1x8x128xf32>,
    %c1_16 = arith.constant 1 : index
    %c0_17 = arith.constant 0 : index
    %c0_18 = arith.constant 0 : index
    %39 = vector.load %arg4[%c1_16, %c0_17, %c0_18] : memref<2x8x128xf32, #tpu.memory_space<vmem>>, vector<1x8x128xf32>
    %40 = vector.shape_cast %39 : vector<1x8x128xf32> to vector<8x128xf32>
    %41 = vector.shape_cast %33 : vector<8x128xf32> to vector<1x8x128xf32>
    tpu.vector_store %arg4[%c1_16, %c0_17, %c0_18], %41 {strides = array<i32>} : memref<2x8x128xf32, #tpu.memory_space<vmem>>, vector<1x8x128xf32>,
    return
  }
}

</mosaic_0001>

<bundles_post_ra>
// kernel: tpu_custom_call.1
= control target key start
LH: loop header
LB: loop body
LE: loop exit
PB: predicated region body
PF: predicated region fallthrough
CT: control target
= control target key end

     0   :  { %9 = vsyncpa [#allocation3], 0  ;;  %s737_s0 = inlined_call_operand.hbm [shape: f32[8,128], index: 0, kind: input, shape index: {}]   ;;  %s738_s1 = inlined_call_operand.hbm [shape: f32[2,8,128], index: 1, kind: input, shape index: {}]   ;;  %s739_s2 = inlined_call_operand.hbm [shape: f32[256,512], index: 2, kind: input, shape index: {}]   ;;  %s740_s3 = inlined_call_operand.vmem [shape: f32[1,512], index: 3, kind: input, shape index: {}]   ;;  %s741_s4 = inlined_call_operand.hbm [shape: f32[2,8,128], index: 4, kind: output, shape index: {}]  }
   0x1   :  { %10 = vsyncpa [#allocation6], 0 }
   0x2   :  { %11 = vsyncpa [#allocation4], 0  ;;  %s647_s15 = smov [#allocation5]   ;;  %s553_s19 = scalar_lea.hbm %s738_s1, 256 }
   0x3   :  { %s27_s16 = sshll.u32 %s647_s15, 4  ;;  %p554_p0 = scmp.ne.s32.totalorder %s738_s1, %s553_s19  ;;  %s28_s16 = int_to_ptr.vmem [resolvable:$true] %s27_s16 }
   0x4   :  { %p557_p1 = scmp.lt.u32.totalorder %s553_s19, %s738_s1 }
   0x6   :  { %p559_p2 = pnand %p557_p1, %p554_p0 }
   0x8   :  { %562 = shalt.err (!%p559_p2)
}
   0x9   :  { %s563_s24 = scalar_lea.vmem %s28_s16, 256  ;;  %p568_p4 = scmp.lt.s32.totalorder %s28_s16, %s28_s16 }
   0xa   :  { %p564_p3 = scmp.ne.s32.totalorder %s28_s16, %s563_s24  ;;  %p569_p5 = scmp.lt.s32.totalorder %s563_s24, %s563_s24 }
   0xc   :  { %p570_p6 = por %p569_p5, %p568_p4 }
   0xe   :  { %p571_p7 = pnand %p570_p6, %p564_p3 }
  0x10   :  { %574 = shalt.err (!%p571_p7)
}
  0x11   :  { %s648_s25 = smov 128   ;;  %s649_s26 = smov 8  }
  0x12   :  { %33 = dma.hbm_to_vmem [thread:$0]  %s738_s1, 256, %s28_s16, [#allocation6], %s648_s25, %s648_s25, %s649_s26  }
  0x13   :  { %s650_s29 = smov [#allocation2]   ;;  %s651_s5 = smov [#allocation7]  }
  0x14   :  { %s18_s30 = sshll.u32 %s650_s29, 4  ;;  %s39_s6 = sshll.u32 %s651_s5, 4  ;;  %s19_s30 = int_to_ptr.vmem [resolvable:$true] %s18_s30  ;;  %s40_s6 = int_to_ptr.vmem [resolvable:$true] %s39_s6 }
  0x15   :  { %s575_s9 = scalar_lea.hbm %s737_s0, 128 }
  0x16   :  { %p576_p8 = scmp.ne.s32.totalorder %s737_s0, %s575_s9  ;;  %p579_p9 = scmp.lt.u32.totalorder %s575_s9, %s737_s0 }
  0x18   :  { %p581_p10 = pnand %p579_p9, %p576_p8 }
  0x1a   :  { %584 = shalt.err (!%p581_p10)
}
  0x1b   :  { %s585_s1 = scalar_lea.vmem %s19_s30, 128  ;;  %p590_p12 = scmp.lt.s32.totalorder %s19_s30, %s19_s30 }
  0x1c   :  { %p586_p11 = scmp.ne.s32.totalorder %s19_s30, %s585_s1  ;;  %p591_p13 = scmp.lt.s32.totalorder %s585_s1, %s585_s1 }
  0x1e   :  { %p592_p0 = por %p591_p13, %p590_p12 }
  0x20   :  { %p593_p1 = pnand %p592_p0, %p586_p11 }
  0x22   :  { %596 = shalt.err (!%p593_p1)
}
  0x23   :  { %21 = dma.hbm_to_vmem [thread:$0]  %s737_s0, 128, %s19_s30, [#allocation3]  }
  0x24   :  { %s597_s18 = scalar_lea.hbm %s739_s2, 16384 }
  0x25   :  { %p598_p2 = scmp.ne.s32.totalorder %s739_s2, %s597_s18  ;;  %p601_p3 = scmp.lt.u32.totalorder %s597_s18, %s739_s2 }
  0x27   :  { %p603_p4 = pnand %p601_p3, %p598_p2 }
  0x29   :  { %606 = shalt.err (!%p603_p4)
}
  0x2a   :  { %s607_s23 = scalar_lea.vmem %s40_s6, 16384  ;;  %p612_p6 = scmp.lt.s32.totalorder %s40_s6, %s40_s6 }
  0x2b   :  { %p608_p5 = scmp.ne.s32.totalorder %s40_s6, %s607_s23  ;;  %p613_p7 = scmp.lt.s32.totalorder %s607_s23, %s607_s23 }
  0x2d   :  { %p614_p8 = por %p613_p7, %p612_p6 }
  0x2f   :  { %p615_p9 = pnand %p614_p8, %p608_p5 }
  0x31   :  { %618 = shalt.err (!%p615_p9)
}
  0x32   :  { %s652_s0 = smov 512   ;;  %s653_s24 = smov 32  }
  0x33   :  { %45 = dma.hbm_to_vmem [thread:$0]  %s739_s2, 16384, %s40_s6, [#allocation6], %s652_s0, %s652_s0, %s653_s24  }
  0x34   :  { %641 = dma.done.wait [#allocation3], 128  }
  0x35   :  { %642 = vsyncadd [#allocation3], 4294967168 }
  0x36   :  { %643 = dma.done.wait [#allocation6], 16640  }
  0x37   :  { %644 = vsyncadd [#allocation6], 4294950656  ;;  %v62_v0 = vld [vmem:[#allocation7 + $0x8] sm:$0xff]  ;;  %v61_v2 = vld [vmem:[#allocation7] sm:$0xff] }
  0x38   :  { %v66_v1 = vld [vmem:[#allocation7 + $0x28] sm:$0xff]  ;;  %v65_v4 = vld [vmem:[#allocation7 + $0x20] sm:$0xff]  ;;  %v64_v18 = vld [vmem:[#allocation7 + $0x18] sm:$0xff] }
  0x39   :  { %v401_v3 = vpack.c.bf16 %v66_v1, %v62_v0  ;;  %v70_v5 = vld [vmem:[#allocation7 + $0x48] sm:$0xff]  ;;  %v403_v7 = vpack.c.bf16 %v65_v4, %v61_v2  ;;  %v69_v9 = vld [vmem:[#allocation7 + $0x40] sm:$0xff]  ;;  %v68_v19 = vld [vmem:[#allocation7 + $0x38] sm:$0xff] }
  0x3a   :  { %v74_v6 = vld [vmem:[#allocation7 + $0x68] sm:$0xff]  ;;  %v73_v10 = vld [vmem:[#allocation7 + $0x60] sm:$0xff]  ;;  %v465_v21 = vpack.c.bf16 %v68_v19, %v64_v18  ;;  %v63_v22 = vld [vmem:[#allocation7 + $0x10] sm:$0xff] }
  0x3b   :  { %v405_v8 = vpack.c.bf16 %v74_v6, %v70_v5  ;;  %v78_v11 = vld [vmem:[#allocation7 + $0x88] sm:$0xff]  ;;  %402 = vmatprep.subr.bf16.mxu0 %v401_v3  ;;  %v407_v13 = vpack.c.bf16 %v73_v10, %v69_v9  ;;  %v77_v14 = vld [vmem:[#allocation7 + $0x80] sm:$0xff]  ;;  %v67_v23 = vld [vmem:[#allocation7 + $0x30] sm:$0xff] }
  0x3c   :  { %v82_v12 = vld [vmem:[#allocation7 + $0xa8] sm:$0xff]  ;;  %404 = vmatpush1.bf16.msra.mxu0 %v403_v7  ;;  %v81_v15 = vld [vmem:[#allocation7 + $0xa0] sm:$0xff]  ;;  %v467_v24 = vpack.c.bf16 %v67_v23, %v63_v22  ;;  %466 = vmatprep.subr.bf16.mxu1 %v465_v21  ;;  %v72_v26 = vld [vmem:[#allocation7 + $0x58] sm:$0xff] }
  0x3d   :  { %406 = vmatprep.subr.bf16.mxu0 %v405_v8  ;;  %v409_v16 = vpack.c.bf16 %v82_v12, %v78_v11  ;;  %v86_v17 = vld [vmem:[#allocation7 + $0xc8] sm:$0xff]  ;;  %v411_v25 = vpack.c.bf16 %v81_v15, %v77_v14  ;;  %v76_v27 = vld [vmem:[#allocation7 + $0x78] sm:$0xff]  ;;  %v71_v28 = vld [vmem:[#allocation7 + $0x50] sm:$0xff] }
  0x3e   :  { %v90_v20 = vld [vmem:[#allocation7 + $0xe8] sm:$0xff]  ;;  %v85_v30 = vld [vmem:[#allocation7 + $0xc0] sm:$0xff]  ;;  %468 = vmatpush1.bf16.msra.mxu1 %v467_v24  ;;  %v469_v32 = vpack.c.bf16 %v76_v27, %v72_v26  ;;  %v75_v33 = vld [vmem:[#allocation7 + $0x70] sm:$0xff] }
  0x3f   :  { %v413_v29 = vpack.c.bf16 %v90_v20, %v86_v17  ;;  %v89_v31 = vld [vmem:[#allocation7 + $0xe0] sm:$0xff]  ;;  %v94_v34 = vld [vmem:[#allocation7 + $0x108] sm:$0xff]  ;;  %v471_v36 = vpack.c.bf16 %v75_v33, %v71_v28  ;;  %v80_v37 = vld [vmem:[#allocation7 + $0x98] sm:$0xff] }
  0x40   :  { %408 = vmatpush1.bf16.msra.mxu0 %v407_v13  ;;  %v98_v35 = vld [vmem:[#allocation7 + $0x128] sm:$0xff]  ;;  %470 = vmatprep.subr.bf16.mxu1 %v469_v32  ;;  %v84_v38 = vld [vmem:[#allocation7 + $0xb8] sm:$0xff]  ;;  %v79_v39 = vld [vmem:[#allocation7 + $0x90] sm:$0xff]  ;;  %v415_v41 = vpack.c.bf16 %v89_v31, %v85_v30 }
  0x41   :  { %410 = vmatprep.subr.bf16.mxu0 %v409_v16  ;;  %v83_v40 = vld [vmem:[#allocation7 + $0xb0] sm:$0xff]  ;;  %v93_v42 = vld [vmem:[#allocation7 + $0x100] sm:$0xff]  ;;  %v473_v44 = vpack.c.bf16 %v84_v38, %v80_v37  ;;  %v417_v45 = vpack.c.bf16 %v98_v35, %v94_v34  ;;  %v102_v46 = vld [vmem:[#allocation7 + $0x148] sm:$0xff] }
  0x42   :  { %v97_v43 = vld [vmem:[#allocation7 + $0x120] sm:$0xff]  ;;  %472 = vmatpush1.bf16.msra.mxu1 %v471_v36  ;;  %v475_v47 = vpack.c.bf16 %v83_v40, %v79_v39  ;;  %v88_v48 = vld [vmem:[#allocation7 + $0xd8] sm:$0xff]  ;;  %v106_v50 = vld [vmem:[#allocation7 + $0x168] sm:$0xff] }
  0x43   :  { %v92_v49 = vld [vmem:[#allocation7 + $0xf8] sm:$0xff]  ;;  %474 = vmatprep.subr.bf16.mxu1 %v473_v44  ;;  %v87_v52 = vld [vmem:[#allocation7 + $0xd0] sm:$0xff]  ;;  %v419_v54 = vpack.c.bf16 %v97_v43, %v93_v42  ;;  %v421_v57 = vpack.c.bf16 %v106_v50, %v102_v46  ;;  %v101_v58 = vld [vmem:[#allocation7 + $0x140] sm:$0xff] }
  0x44   :  { %412 = vmatpush1.bf16.msra.mxu0 %v411_v25  ;;  %v477_v51 = vpack.c.bf16 %v92_v49, %v88_v48  ;;  %v91_v53 = vld [vmem:[#allocation7 + $0xf0] sm:$0xff]  ;;  %v96_v55 = vld [vmem:[#allocation7 + $0x118] sm:$0xff]  ;;  %v105_v59 = vld [vmem:[#allocation7 + $0x160] sm:$0xff] }
  0x45   :  { %414 = vmatprep.subr.bf16.mxu0 %v413_v29  ;;  %v100_v56 = vld [vmem:[#allocation7 + $0x138] sm:$0xff]  ;;  %v110_v60 = vld [vmem:[#allocation7 + $0x188] sm:$0xff]  ;;  %v479_v61 = vpack.c.bf16 %v91_v53, %v87_v52  ;;  %v95_v0 = vld [vmem:[#allocation7 + $0x110] sm:$0xff]  ;;  %v423_v4 = vpack.c.bf16 %v105_v59, %v101_v58 }
  0x46   :  { %476 = vmatpush1.bf16.msra.mxu1 %v475_v47  ;;  %v114_v62 = vld [vmem:[#allocation7 + $0x1a8] sm:$0xff]  ;;  %v481_v63 = vpack.c.bf16 %v100_v56, %v96_v55  ;;  %v99_v1 = vld [vmem:[#allocation7 + $0x130] sm:$0xff]  ;;  %v104_v2 = vld [vmem:[#allocation7 + $0x158] sm:$0xff] }
  0x47   :  { %478 = vmatprep.subr.bf16.mxu1 %v477_v51  ;;  %v108_v3 = vld [vmem:[#allocation7 + $0x178] sm:$0xff]  ;;  %v425_v5 = vpack.c.bf16 %v114_v62, %v110_v60  ;;  %v109_v6 = vld [vmem:[#allocation7 + $0x180] sm:$0xff]  ;;  %v118_v8 = vld [vmem:[#allocation7 + $0x1c8] sm:$0xff]  ;;  %v483_v9 = vpack.c.bf16 %v99_v1, %v95_v0 }
  0x48   :  { %416 = vmatpush1.bf16.msra.mxu0 %v415_v41  ;;  %v113_v7 = vld [vmem:[#allocation7 + $0x1a0] sm:$0xff]  ;;  %v122_v10 = vld [vmem:[#allocation7 + $0x1e8] sm:$0xff]  ;;  %v485_v11 = vpack.c.bf16 %v108_v3, %v104_v2  ;;  %v103_v12 = vld [vmem:[#allocation7 + $0x150] sm:$0xff] }
  0x49   :  { %418 = vmatprep.subr.bf16.mxu0 %v417_v45  ;;  %v107_v13 = vld [vmem:[#allocation7 + $0x170] sm:$0xff]  ;;  %v112_v14 = vld [vmem:[#allocation7 + $0x198] sm:$0xff]  ;;  %v427_v16 = vpack.c.bf16 %v113_v7, %v109_v6  ;;  %v429_v17 = vpack.c.bf16 %v122_v10, %v118_v8  ;;  %v117_v18 = vld [vmem:[#allocation7 + $0x1c0] sm:$0xff] }
  0x4a   :  { %480 = vmatpush1.bf16.msra.mxu1 %v479_v61  ;;  %v116_v15 = vld [vmem:[#allocation7 + $0x1b8] sm:$0xff]  ;;  %v121_v19 = vld [vmem:[#allocation7 + $0x1e0] sm:$0xff]  ;;  %v126_v20 = vld [vmem:[#allocation7 + $0x208] sm:$0xff]  ;;  %v487_v21 = vpack.c.bf16 %v107_v13, %v103_v12 }
  0x4b   :  { %482 = vmatprep.subr.bf16.mxu1 %v481_v63  ;;  %v130_v22 = vld [vmem:[#allocation7 + $0x228] sm:$0xff]  ;;  %v489_v23 = vpack.c.bf16 %v116_v15, %v112_v14  ;;  %v111_v24 = vld [vmem:[#allocation7 + $0x190] sm:$0xff]  ;;  %v120_v26 = vld [vmem:[#allocation7 + $0x1d8] sm:$0xff]  ;;  %v431_v28 = vpack.c.bf16 %v121_v19, %v117_v18 }
  0x4c   :  { %420 = vmatpush1.bf16.msra.mxu0 %v419_v54  ;;  %v115_v25 = vld [vmem:[#allocation7 + $0x1b0] sm:$0xff]  ;;  %v124_v27 = vld [vmem:[#allocation7 + $0x1f8] sm:$0xff]  ;;  %v433_v29 = vpack.c.bf16 %v130_v22, %v126_v20  ;;  %v125_v30 = vld [vmem:[#allocation7 + $0x200] sm:$0xff] }
  0x4d   :  { %422 = vmatprep.subr.bf16.mxu0 %v421_v57  ;;  %v129_v31 = vld [vmem:[#allocation7 + $0x220] sm:$0xff]  ;;  %v134_v32 = vld [vmem:[#allocation7 + $0x248] sm:$0xff]  ;;  %v491_v33 = vpack.c.bf16 %v115_v25, %v111_v24  ;;  %v493_v35 = vpack.c.bf16 %v124_v27, %v120_v26  ;;  %v119_v36 = vld [vmem:[#allocation7 + $0x1d0] sm:$0xff] }
  0x4e   :  { %484 = vmatpush1.bf16.msra.mxu1 %v483_v9  ;;  %v138_v34 = vld [vmem:[#allocation7 + $0x268] sm:$0xff]  ;;  %v123_v37 = vld [vmem:[#allocation7 + $0x1f0] sm:$0xff]  ;;  %v128_v38 = vld [vmem:[#allocation7 + $0x218] sm:$0xff]  ;;  %v435_v40 = vpack.c.bf16 %v129_v31, %v125_v30 }
  0x4f   :  { %486 = vmatprep.subr.bf16.mxu1 %v485_v11  ;;  %v132_v39 = vld [vmem:[#allocation7 + $0x238] sm:$0xff]  ;;  %v437_v41 = vpack.c.bf16 %v138_v34, %v134_v32  ;;  %v133_v42 = vld [vmem:[#allocation7 + $0x240] sm:$0xff]  ;;  %v142_v44 = vld [vmem:[#allocation7 + $0x288] sm:$0xff]  ;;  %v495_v45 = vpack.c.bf16 %v123_v37, %v119_v36 }
  0x50   :  { %424 = vmatpush1.bf16.msra.mxu0 %v423_v4  ;;  %v137_v43 = vld [vmem:[#allocation7 + $0x260] sm:$0xff]  ;;  %v146_v46 = vld [vmem:[#allocation7 + $0x2a8] sm:$0xff]  ;;  %v497_v47 = vpack.c.bf16 %v132_v39, %v128_v38  ;;  %v127_v48 = vld [vmem:[#allocation7 + $0x210] sm:$0xff] }
  0x51   :  { %426 = vmatprep.subr.bf16.mxu0 %v425_v5  ;;  %v131_v49 = vld [vmem:[#allocation7 + $0x230] sm:$0xff]  ;;  %v136_v50 = vld [vmem:[#allocation7 + $0x258] sm:$0xff]  ;;  %v439_v52 = vpack.c.bf16 %v137_v43, %v133_v42  ;;  %v141_v53 = vld [vmem:[#allocation7 + $0x280] sm:$0xff]  ;;  %v441_v54 = vpack.c.bf16 %v146_v46, %v142_v44 }
  0x52   :  { %488 = vmatpush1.bf16.msra.mxu1 %v487_v21  ;;  %v140_v51 = vld [vmem:[#allocation7 + $0x278] sm:$0xff]  ;;  %v145_v55 = vld [vmem:[#allocation7 + $0x2a0] sm:$0xff]  ;;  %v150_v56 = vld [vmem:[#allocation7 + $0x2c8] sm:$0xff]  ;;  %v499_v58 = vpack.c.bf16 %v131_v49, %v127_v48 }
  0x53   :  { %490 = vmatprep.subr.bf16.mxu1 %v489_v23  ;;  %v154_v57 = vld [vmem:[#allocation7 + $0x2e8] sm:$0xff]  ;;  %v501_v59 = vpack.c.bf16 %v140_v51, %v136_v50  ;;  %v135_v60 = vld [vmem:[#allocation7 + $0x250] sm:$0xff]  ;;  %v144_v63 = vld [vmem:[#allocation7 + $0x298] sm:$0xff]  ;;  %v443_v1 = vpack.c.bf16 %v145_v55, %v141_v53 }
  0x54   :  { %428 = vmatpush1.bf16.msra.mxu0 %v427_v16  ;;  %v139_v61 = vld [vmem:[#allocation7 + $0x270] sm:$0xff]  ;;  %v148_v0 = vld [vmem:[#allocation7 + $0x2b8] sm:$0xff]  ;;  %v445_v2 = vpack.c.bf16 %v154_v57, %v150_v56  ;;  %v149_v3 = vld [vmem:[#allocation7 + $0x2c0] sm:$0xff] }
  0x55   :  { %430 = vmatprep.subr.bf16.mxu0 %v429_v17  ;;  %v58_v62 = vld [vmem:[#allocation5] sm:$0xff]  ;;  %v153_v4 = vld [vmem:[#allocation7 + $0x2e0] sm:$0xff]  ;;  %v158_v5 = vld [vmem:[#allocation7 + $0x308] sm:$0xff]  ;;  %v503_v6 = vpack.c.bf16 %v139_v61, %v135_v60  ;;  %v505_v8 = vpack.c.bf16 %v148_v0, %v144_v63 }
  0x56   :  { %492 = vmatpush1.bf16.msra.mxu1 %v491_v33  ;;  %275 = vmatprep.mubr.f32.mxu0 %v58_v62  ;;  %v162_v7 = vld [vmem:[#allocation7 + $0x328] sm:$0xff]  ;;  %v143_v9 = vld [vmem:[#allocation7 + $0x290] sm:$0xff]  ;;  %v152_v11 = vld [vmem:[#allocation7 + $0x2d8] sm:$0xff]  ;;  %v447_v13 = vpack.c.bf16 %v153_v4, %v149_v3 }
  0x57   :  { %494 = vmatprep.subr.bf16.mxu1 %v493_v35  ;;  %346 = vmatprep.mubr.f32.mxu1 %v58_v62  ;;  %v147_v10 = vld [vmem:[#allocation7 + $0x2b0] sm:$0xff]  ;;  %v156_v12 = vld [vmem:[#allocation7 + $0x2f8] sm:$0xff]  ;;  %v449_v14 = vpack.c.bf16 %v162_v7, %v158_v5  ;;  %v157_v15 = vld [vmem:[#allocation7 + $0x300] sm:$0xff] }
  0x58   :  { %432 = vmatpush1.bf16.msra.mxu0 %v431_v28  ;;  %v161_v16 = vld [vmem:[#allocation7 + $0x320] sm:$0xff]  ;;  %v166_v17 = vld [vmem:[#allocation7 + $0x348] sm:$0xff]  ;;  %v507_v18 = vpack.c.bf16 %v147_v10, %v143_v9  ;;  %v509_v20 = vpack.c.bf16 %v156_v12, %v152_v11  ;;  %v151_v21 = vld [vmem:[#allocation7 + $0x2d0] sm:$0xff] }
  0x59   :  { %434 = vmatprep.subr.bf16.mxu0 %v433_v29  ;;  %v170_v19 = vld [vmem:[#allocation7 + $0x368] sm:$0xff]  ;;  %v155_v22 = vld [vmem:[#allocation7 + $0x2f0] sm:$0xff]  ;;  %v160_v23 = vld [vmem:[#allocation7 + $0x318] sm:$0xff]  ;;  %v451_v25 = vpack.c.bf16 %v161_v16, %v157_v15 }
  0x5a   :  { %496 = vmatpush1.bf16.msra.mxu1 %v495_v45  ;;  %v164_v24 = vld [vmem:[#allocation7 + $0x338] sm:$0xff]  ;;  %v453_v26 = vpack.c.bf16 %v170_v19, %v166_v17  ;;  %v165_v27 = vld [vmem:[#allocation7 + $0x340] sm:$0xff]  ;;  %v174_v29 = vld [vmem:[#allocation7 + $0x388] sm:$0xff]  ;;  %v511_v30 = vpack.c.bf16 %v155_v22, %v151_v21 }
  0x5b   :  { %498 = vmatprep.subr.bf16.mxu1 %v497_v47  ;;  %v169_v28 = vld [vmem:[#allocation7 + $0x360] sm:$0xff]  ;;  %v178_v31 = vld [vmem:[#allocation7 + $0x3a8] sm:$0xff]  ;;  %v513_v32 = vpack.c.bf16 %v164_v24, %v160_v23  ;;  %v159_v33 = vld [vmem:[#allocation7 + $0x310] sm:$0xff] }
  0x5c   :  { %436 = vmatpush1.bf16.msra.mxu0 %v435_v40  ;;  %v163_v34 = vld [vmem:[#allocation7 + $0x330] sm:$0xff]  ;;  %v168_v35 = vld [vmem:[#allocation7 + $0x358] sm:$0xff]  ;;  %v455_v37 = vpack.c.bf16 %v169_v28, %v165_v27  ;;  %v457_v38 = vpack.c.bf16 %v178_v31, %v174_v29  ;;  %v173_v39 = vld [vmem:[#allocation7 + $0x380] sm:$0xff] }
  0x5d   :  { %438 = vmatprep.subr.bf16.mxu0 %v437_v41  ;;  %v172_v36 = vld [vmem:[#allocation7 + $0x378] sm:$0xff]  ;;  %v177_v40 = vld [vmem:[#allocation7 + $0x3a0] sm:$0xff]  ;;  %v182_v41 = vld [vmem:[#allocation7 + $0x3c8] sm:$0xff]  ;;  %v515_v42 = vpack.c.bf16 %v163_v34, %v159_v33 }
  0x5e   :  { %500 = vmatpush1.bf16.msra.mxu1 %v499_v58  ;;  %v186_v43 = vld [vmem:[#allocation7 + $0x3e8] sm:$0xff]  ;;  %v517_v44 = vpack.c.bf16 %v172_v36, %v168_v35  ;;  %v167_v45 = vld [vmem:[#allocation7 + $0x350] sm:$0xff]  ;;  %v176_v47 = vld [vmem:[#allocation7 + $0x398] sm:$0xff]  ;;  %v459_v49 = vpack.c.bf16 %v177_v40, %v173_v39 }
  0x5f   :  { %502 = vmatprep.subr.bf16.mxu1 %v501_v59  ;;  %v171_v46 = vld [vmem:[#allocation7 + $0x370] sm:$0xff]  ;;  %v180_v48 = vld [vmem:[#allocation7 + $0x3b8] sm:$0xff]  ;;  %v461_v50 = vpack.c.bf16 %v186_v43, %v182_v41  ;;  %v181_v51 = vld [vmem:[#allocation7 + $0x3c0] sm:$0xff] }
  0x60   :  { %440 = vmatpush1.bf16.msra.mxu0 %v439_v52  ;;  %v185_v52 = vld [vmem:[#allocation7 + $0x3e0] sm:$0xff]  ;;  %v519_v53 = vpack.c.bf16 %v171_v46, %v167_v45  ;;  %v175_v55 = vld [vmem:[#allocation7 + $0x390] sm:$0xff]  ;;  %v184_v57 = vld [vmem:[#allocation7 + $0x3d8] sm:$0xff] }
  0x61   :  { %442 = vmatprep.subr.bf16.mxu0 %v441_v54  ;;  %v521_v54 = vpack.c.bf16 %v180_v48, %v176_v47  ;;  %v179_v56 = vld [vmem:[#allocation7 + $0x3b0] sm:$0xff]  ;;  %v188_v58 = vld [vmem:[#allocation7 + $0x3f8] sm:$0xff]  ;;  %v463_v59 = vpack.c.bf16 %v185_v52, %v181_v51  ;;  %v57_v0 = vld [vmem:[#allocation2] sm:$0xff] }
  0x62   :  { %504 = vmatpush1.bf16.msra.mxu1 %v503_v6  ;;  %v523_v60 = vpack.c.bf16 %v179_v56, %v175_v55  ;;  %v525_v61 = vpack.c.bf16 %v188_v58, %v184_v57  ;;  %v183_v62 = vld [vmem:[#allocation7 + $0x3d0] sm:$0xff]  ;;  %v189_v5 = vld [vmem:[%s740_s3] sm:$0xf]  ;;  %s654_s3 = smov [#allocation8]  }
  0x63   :  { %506 = vmatprep.subr.bf16.mxu1 %v505_v8  ;;  %v187_v63 = vld [vmem:[#allocation7 + $0x3f0] sm:$0xff]  ;;  %s385_s30 = sshll.u32 %s654_s3, 4  ;;  %s386_s30 = int_to_ptr.vmem [resolvable:$true] %s385_s30 }
  0x64   :  { %444 = vmatpush1.bf16.msra.mxu0 %v443_v1  ;;  %v527_v1 = vpack.c.bf16 %v187_v63, %v183_v62  ;;  %s619_s5 = scalar_lea.vmem %s386_s30, 256  ;;  %p624_p11 = scmp.lt.s32.totalorder %s386_s30, %s386_s30 }
  0x65   :  { %446 = vmatprep.subr.bf16.mxu0 %v445_v2  ;;  %v191_v2 = vlaneseq  ;;  %p620_p10 = scmp.ne.s32.totalorder %s386_s30, %s619_s5  ;;  %p625_p12 = scmp.lt.s32.totalorder %s619_s5, %s619_s5 }
  0x66   :  { %508 = vmatpush1.bf16.msra.mxu1 %v507_v18 }
  0x67   :  { %510 = vmatprep.subr.bf16.mxu1 %v509_v20  ;;  %v192_v3 = vshrl.u32 %v191_v2, 7  ;;  %p626_p13 = por %p625_p12, %p624_p11 }
  0x68   :  { %448 = vmatpush1.bf16.msra.mxu0 %v447_v13 }
  0x69   :  { %450 = vmatprep.subr.bf16.mxu0 %v449_v14  ;;  %v193_v4 = vsub.s32 0, %v192_v3  ;;  %v197_v6 = vsub.s32 1, %v192_v3  ;;  %v205_v9 = vsub.s32 3, %v192_v3  ;;  %v201_v17 = vsub.s32 2, %v192_v3  ;;  %p627_p0 = pnand %p626_p13, %p620_p10 }
  0x6a   :  { %512 = vmatpush1.bf16.msra.mxu1 %v511_v30  ;;  %v60_v30 = vld [vmem:[#allocation5 + $0x8] sm:$0xff] }
  0x6b   :  { %514 = vmatprep.subr.bf16.mxu1 %v513_v32  ;;  %v194_v7 = vrot.slane %v189_v5, %v193_v4  ;;  %v198_v8 = vrot.slane %v189_v5, %v197_v6  ;;  %v206_v15 = vrot.slane %v189_v5, %v205_v9  ;;  %v202_v21 = vrot.slane %v189_v5, %v201_v17 }
  0x6c   :  { %452 = vmatpush1.bf16.msra.mxu0 %v451_v25 }
  0x6d   :  { %454 = vmatprep.subr.bf16.mxu0 %v453_v26 }
  0x6e   :  { %516 = vmatpush1.bf16.msra.mxu1 %v515_v42 }
  0x6f   :  { %518 = vmatprep.subr.bf16.mxu1 %v517_v44 }
  0x70   :  { %456 = vmatpush1.bf16.msra.mxu0 %v455_v37 }
  0x71   :  { %458 = vmatprep.subr.bf16.mxu0 %v457_v38 }
  0x72   :  { %520 = vmatpush1.bf16.msra.mxu1 %v519_v53 }
  0x73   :  { %522 = vmatprep.subr.bf16.mxu1 %v521_v54 }
  0x74   :  { %460 = vmatpush1.bf16.msra.mxu0 %v459_v49 }
  0x75   :  { %462 = vmatprep.subr.bf16.mxu0 %v461_v50 }
  0x76   :  { %524 = vmatpush1.bf16.msra.mxu1 %v523_v60 }
  0x77   :  { %526 = vmatprep.subr.bf16.mxu1 %v525_v61 }
  0x78   :  { %464 = vmatpush1.bf16.msra.mxu0 %v463_v59 }
  0x7a   :  { %528 = vmatpush1.bf16.msra.mxu1 %v527_v1 }
  0x7b   :  { %276 = vmatmul.mubr.f32.vlgmr.msra.gmra.mrb[0].mxu0 %v57_v0 }
  0x7d   :  { %347 = vmatmul.mubr.f32.vlgmr.msra.gmra.mrb[0].mxu1 %v57_v0 }
 0x14e   :  { %v277_v10 = vpop.f32.mrb[0].mxu0 }
 0x14f   :  { %v278_v11 = vadd.f32 %v277_v10, %v194_v7  ;;  %v279_v12 = vpop.f32.mrb[1].mxu0 }
 0x150   :  { %v280_v13 = vadd.f32 %v279_v12, %v198_v8  ;;  %v348_v18 = vpop.f32.mrb[0].mxu1 }
 0x151   :  { %v398_v14 = vmul.f32 -1.442695, %v278_v11  ;;  %v350_v19 = vpop.f32.mrb[1].mxu1  ;;  %v349_v23 = vadd.f32 %v348_v18, %v202_v21 }
 0x152   :  { %v399_v16 = vmul.f32 -1.442695, %v280_v13  ;;  %v351_v20 = vadd.f32 %v350_v19, %v206_v15 }
 0x153   :  { %537 = vpow2.f32 %v398_v14 }
 0x154   :  { %539 = vpow2.f32 %v399_v16  ;;  %v400_v22 = vmul.f32 -1.442695, %v351_v20 }
 0x156   :  { %541 = vpow2.f32 %v400_v22 }
 0x157   :  { %543 = vtanh.f32 %v349_v23 }
 0x15d   :  { %v538_v24 = vpop.eup %537 }
 0x15e   :  { %v540_v25 = vpop.eup %539  ;;  %v356_v26 = vadd.f32 1.0, %v538_v24 }
 0x15f   :  { %v362_v27 = vadd.f32 1.0, %v540_v25 }
 0x160   :  { %545 = vrcp.f32 %v356_v26  ;;  %v542_v28 = vpop.eup %541 }
 0x161   :  { %547 = vrcp.f32 %v362_v27  ;;  %v544_v29 = vpop.eup %543  ;;  %v369_v32 = vadd.f32 1.0, %v542_v28 }
 0x163   :  { %549 = vrcp.f32 %v369_v32 }
 0x16a   :  { %v546_v31 = vpop.eup %545 }
 0x16b   :  { %v548_v33 = vpop.eup %547  ;;  %v373_v34 = vmul.f32 %v546_v31, %v544_v29 }
 0x16c   :  { %v372_v35 = vmul.f32 %v548_v33, %v60_v30 }
 0x16d   :  { %v550_v37 = vpop.eup %549 }
 0x16e   :  { %v374_v36 = vadd.f32 %v373_v34, %v372_v35 }
 0x170   :  { %551 = vtanh.f32 %v374_v36  ;;  %379 = vst [vmem:[#allocation8 + $0x8] sm:$0xff] %v374_v36 }
 0x17a   :  { %v552_v38 = vpop.eup %551 }
 0x17b   :  { %v376_v39 = vmul.f32 %v552_v38, %v550_v37 }
 0x17d   :  { %377 = vst [vmem:[#allocation8] sm:$0xff] %v376_v39 }
 0x17e   :  { %630 = shalt.err (!%p627_p0)
}
 0x17f   :  { %s631_s8 = scalar_lea.hbm %s741_s4, 256 }
 0x180   :  { %p632_p1 = scmp.ne.s32.totalorder %s741_s4, %s631_s8  ;;  %p635_p2 = scmp.lt.u32.totalorder %s631_s8, %s741_s4 }
 0x182   :  { %p637_p3 = pnand %p635_p2, %p632_p1 }
 0x184   :  { %640 = shalt.err (!%p637_p3)
}
 0x185   :  { %391 = dma.vmem_to_hbm [thread:$0]  %s386_s30, 256, %s741_s4, [#allocation4], %s648_s25, %s648_s25, %s649_s26  }
 0x186   :  { %645 = dma.done.wait [#allocation4], 256  }
 0x187   :  { %646 = vsyncadd [#allocation4], 4294967040 }
 0x188   :  { %395 = vsyncpa [#allocation3], 1 }
 0x189   :  { %396 = vsyncpa [#allocation6], 1 }
 0x18a   :  { %397 = vsyncpa [#allocation4], 1 }

</bundles_post_ra>
